<compile_context>
chip_gen: v7x
topology: tpu7x:2x2x1
jax: 0.10.0
libtpu: 0.0.40
codegen_flags: <defaults>
</compile_context>

<pallas_src>
import jax
import jax.numpy as jnp
from jax.experimental import pallas as pl
from jax.experimental.pallas import tpu as pltpu


def _round_up(x: int, m: int) -> int:
    return ((x + m - 1) // m) * m


def _linear_kernel(x_ref, wt_ref, b_ref, o_ref):
    # bf16 operands -> MXU, f32 accumulation; bias add stays on the f32 accumulator (VPU).
    acc = jnp.dot(x_ref[...], wt_ref[...], preferred_element_type=jnp.float32)
    o_ref[...] = acc + b_ref[...]


def prepare_linear_params(weight, bias):
    """One-time prep (frozen probe): transpose to [D, C], pad C to a multiple of 128,
    cast weight to bf16 for the MXU, keep bias in f32 for the epilogue add."""
    C, D = weight.shape
    Cp = _round_up(C, 128)
    wt = jnp.zeros((D, Cp), jnp.float32).at[:, :C].set(weight.T).astype(jnp.bfloat16)
    b2 = jnp.zeros((1, Cp), jnp.float32).at[:, :C].set(bias.astype(jnp.float32))
    return wt, b2, C


def linear_classifier(x, wt_padded, b_padded, num_class):
    """x: [B, D] float32; wt_padded: [D, Cp] bf16; b_padded: [1, Cp] f32 -> [B, num_class] f32."""
    B, D = x.shape
    D2, Cp = wt_padded.shape
    assert D == D2 and Cp % 128 == 0

    # Batch tiling: sublane-aligned tiles, up to 512 rows per step for good pipelining.
    Bp = _round_up(B, 8)
    TM = 512 if Bp >= 512 else Bp
    Bp = _round_up(Bp, TM)

    x_bf = x.astype(jnp.bfloat16)
    if Bp != B:
        x_bf = jnp.pad(x_bf, ((0, Bp - B), (0, 0)))

    out = pl.pallas_call(
        _linear_kernel,
        out_shape=jax.ShapeDtypeStruct((Bp, Cp), jnp.float32),
        grid=(Bp // TM,),
        in_specs=[
            pl.BlockSpec((TM, D), lambda i: (i, 0)),    # x tile: streamed / double-buffered
            pl.BlockSpec((D, Cp), lambda i: (0, 0)),    # weight: resident across the grid
            pl.BlockSpec((1, Cp), lambda i: (0, 0)),    # bias:   resident across the grid
        ],
        out_specs=pl.BlockSpec((TM, Cp), lambda i: (i, 0)),
        compiler_params=pltpu.CompilerParams(
            dimension_semantics=("parallel",),          # shard batch tiles across TCs (v7x)
        ),
    )(x_bf, wt_padded, b_padded)

    return out[:B, :num_class]


if __name__ == "__main__":
    # Small shapes consistent with the module: dim=32 features, 100 classes.
    B, DIM, NUM_CLASS = 8, 32, 100

    key = jax.random.PRNGKey(0)
    kx, kw = jax.random.split(key)

    # Deterministic parameter init mirroring the PyTorch module:
    #   weight ~ N(0, 0.01), bias = 0
    weight = 0.01 * jax.random.normal(kw, (NUM_CLASS, DIM), dtype=jnp.float32)
    bias = jnp.zeros((NUM_CLASS,), dtype=jnp.float32)

    x = jax.random.normal(kx, (B, DIM), dtype=jnp.float32)

    # One-time param prep (outside the per-call hot path).
    wt_padded, b_padded, _ = prepare_linear_params(weight, bias)

    out = linear_classifier(x, wt_padded, b_padded, NUM_CLASS)
    jax.block_until_ready(out)

    assert out.shape == (B, NUM_CLASS)

    # Tight check vs. a reference using the same bf16 operands / f32 accumulation.
    ref_bf16 = jnp.dot(
        x.astype(jnp.bfloat16), weight.T.astype(jnp.bfloat16),
        preferred_element_type=jnp.float32,
    ) + bias
    assert jnp.allclose(out, ref_bf16, atol=1e-5, rtol=1e-4)

    # Loose check vs. the full-f32 reference (bf16 operand rounding is the only delta).
    ref_f32 = x @ weight.T + bias
    assert jnp.allclose(out, ref_f32, atol=1e-2, rtol=1e-2)

    print("KERNEL_OK")
</pallas_src>

<mosaic_0001>
module attributes {stable_mosaic.version = 11 : i64} {
  func.func @_linear_kernel(%arg0: i32, %arg1: memref<8x32xbf16, #tpu.memory_space<vmem>>, %arg2: memref<32x128xbf16, #tpu.memory_space<vmem>>, %arg3: memref<1x128xf32, #tpu.memory_space<vmem>>, %arg4: memref<8x128xf32, #tpu.memory_space<vmem>>) attributes {dimension_semantics = [#tpu.dimension_semantics<parallel>], iteration_bounds = array<i64: 1>, scalar_prefetch = 0 : i64, scratch_operands = 0 : i64, tpu.core_type = #tpu.core_type<tc>, window_params = [{transform_indices = @transform_0, window_bounds = array<i64: 8, 32>}, {pipeline_mode = #tpu.pipeline_mode<synchronous>, transform_indices = @transform_1, window_bounds = array<i64: 32, 128>}, {pipeline_mode = #tpu.pipeline_mode<synchronous>, transform_indices = @transform_2, window_bounds = array<i64: 1, 128>}, {transform_indices = @transform_3, window_bounds = array<i64: 8, 128>}]} {
    %c0 = arith.constant 0 : index
    %c0_0 = arith.constant 0 : index
    %0 = vector.load %arg1[%c0, %c0_0] : memref<8x32xbf16, #tpu.memory_space<vmem>>, vector<8x32xbf16>
    %c0_1 = arith.constant 0 : index
    %c0_2 = arith.constant 0 : index
    %1 = vector.load %arg2[%c0_1, %c0_2] : memref<32x128xbf16, #tpu.memory_space<vmem>>, vector<32x128xbf16>
    %cst = arith.constant dense<0.000000e+00> : vector<8x128xf32>
    %2 = tpu.matmul %0, %1, %cst {dimension_numbers = #tpu.dot_dimension_numbers<[1], [0], [0], [1], [0, 0, 1, 1], [], []>} : vector<8x32xbf16>, vector<32x128xbf16>, vector<8x128xf32> -> vector<8x128xf32>
    %c0_3 = arith.constant 0 : index
    %c0_4 = arith.constant 0 : index
    %3 = vector.load %arg3[%c0_3, %c0_4] : memref<1x128xf32, #tpu.memory_space<vmem>>, vector<1x128xf32>
    %4 = vector.broadcast %3 : vector<1x128xf32> to vector<8x128xf32>
    %5 = arith.addf %2, %4 : vector<8x128xf32>
    %c0_5 = arith.constant 0 : index
    %c0_6 = arith.constant 0 : index
    %6 = vector.load %arg4[%c0_5, %c0_6] : memref<8x128xf32, #tpu.memory_space<vmem>>, vector<8x128xf32>
    tpu.vector_store %arg4[%c0_5, %c0_6], %5 {strides = array<i32>} : memref<8x128xf32, #tpu.memory_space<vmem>>, vector<8x128xf32>,
    return
  }
  func.func @transform_0(%arg0: i32) -> (i32, i32) {
    %c0_i32 = arith.constant 0 : i32
    %c0_i32_0 = arith.constant 0 : i32
    return %arg0, %c0_i32 : i32, i32
  }
  func.func @transform_1(%arg0: i32) -> (i32, i32) {
    %c0_i32 = arith.constant 0 : i32
    %c0_i32_0 = arith.constant 0 : i32
    %c0_i32_1 = arith.constant 0 : i32
    return %c0_i32, %c0_i32_0 : i32, i32
  }
  func.func @transform_2(%arg0: i32) -> (i32, i32) {
    %c0_i32 = arith.constant 0 : i32
    %c0_i32_0 = arith.constant 0 : i32
    %c0_i32_1 = arith.constant 0 : i32
    return %c0_i32, %c0_i32_0 : i32, i32
  }
  func.func @transform_3(%arg0: i32) -> (i32, i32) {
    %c0_i32 = arith.constant 0 : i32
    %c0_i32_0 = arith.constant 0 : i32
    return %arg0, %c0_i32 : i32, i32
  }
}

</mosaic_0001>

<bundles_post_ra>
// kernel: tpu_custom_call.1
= control target key start
LH: loop header
LB: loop body
LE: loop exit
PB: predicated region body
PF: predicated region fallthrough
CT: control target
= control target key end

     0   :  { %8 = vsyncpa [#allocation3], 0  ;;  %s296_s0 = inlined_call_operand.hbm [shape: bf16[8,32], index: 0, kind: input, shape index: {}]   ;;  %s297_s1 = inlined_call_operand.hbm [shape: bf16[32,128], index: 1, kind: input, shape index: {}]   ;;  %s298_s2 = inlined_call_operand.vmem [shape: f32[1,128], index: 2, kind: input, shape index: {}]   ;;  %s299_s3 = inlined_call_operand.hbm [shape: f32[8,128], index: 3, kind: output, shape index: {}]  }
   0x1   :  { %9 = vsyncpa [#allocation6], 0 }
   0x2   :  { %10 = vsyncpa [#allocation4], 0  ;;  %s223_s12 = smov [#allocation2]   ;;  %s224_s14 = smov [#allocation5]  }
   0x3   :  { %s17_s13 = sshll.u32 %s223_s12, 4  ;;  %s26_s15 = sshll.u32 %s224_s14, 4  ;;  %s18_s13 = int_to_ptr.vmem [resolvable:$true] %s17_s13  ;;  %s250_s15 = int_to_ptr.vmem [resolvable:$true] %s26_s15 }
   0x4   :  { %s151_s18 = scalar_lea.hbm %s296_s0, 64 }
   0x5   :  { %p152_p0 = scmp.ne.s32.totalorder %s296_s0, %s151_s18  ;;  %p155_p1 = scmp.lt.u32.totalorder %s151_s18, %s296_s0 }
   0x7   :  { %p157_p2 = pnand %p155_p1, %p152_p0 }
   0x9   :  { %160 = shalt.err (!%p157_p2)
}
   0xa   :  { %s161_s23 = scalar_lea.vmem %s18_s13, 64  ;;  %p166_p4 = scmp.lt.s32.totalorder %s18_s13, %s18_s13 }
   0xb   :  { %p162_p3 = scmp.ne.s32.totalorder %s18_s13, %s161_s23  ;;  %p167_p5 = scmp.lt.s32.totalorder %s161_s23, %s161_s23 }
   0xd   :  { %p168_p6 = por %p167_p5, %p166_p4 }
   0xf   :  { %p169_p7 = pnand %p168_p6, %p162_p3 }
  0x11   :  { %172 = shalt.err (!%p169_p7)
}
  0x12   :  { %20 = dma.hbm_to_vmem [thread:$0]  %s296_s0, 64, %s18_s13, [#allocation3]  }
  0x13   :  { %s173_s28 = scalar_lea.hbm %s297_s1, 256 }
  0x14   :  { %p174_p8 = scmp.ne.s32.totalorder %s297_s1, %s173_s28  ;;  %p177_p9 = scmp.lt.u32.totalorder %s173_s28, %s297_s1 }
  0x16   :  { %p179_p10 = pnand %p177_p9, %p174_p8 }
  0x18   :  { %182 = shalt.err (!%p179_p10)
}
  0x19   :  { %s183_s6 = scalar_lea.vmem %s250_s15, 256  ;;  %p188_p12 = scmp.lt.s32.totalorder %s250_s15, %s250_s15 }
  0x1a   :  { %p184_p11 = scmp.ne.s32.totalorder %s250_s15, %s183_s6  ;;  %p189_p13 = scmp.lt.s32.totalorder %s183_s6, %s183_s6 }
  0x1c   :  { %p190_p0 = por %p189_p13, %p188_p12 }
  0x1e   :  { %p191_p1 = pnand %p190_p0, %p184_p11 }
  0x20   :  { %194 = shalt.err (!%p191_p1)
}
  0x21   :  { %s225_s0 = smov 64   ;;  %s226_s7 = smov 4  }
  0x22   :  { %32 = dma.hbm_to_vmem [thread:$0]  %s297_s1, 256, %s250_s15, [#allocation6], %s225_s0, %s225_s0, %s226_s7  }
  0x23   :  { %217 = dma.done.wait [#allocation3], 64  }
  0x24   :  { %218 = vsyncadd [#allocation3], 4294967232 }
  0x25   :  { %219 = dma.done.wait [#allocation6], 256  }
  0x26   :  { %220 = vsyncadd [#allocation6], 4294967040  ;;  %v227_v0 = vmov 0.0   ;;  %vm228_vm0 = vmmov 0   ;;  %v149_v1 = vld [vmem:[#allocation5] sm:$0xff]   ;;  %v150_v2 = vld [vmem:[#allocation5 + $0x8] sm:$0xff]  }
  0x27   :  { %134 = vmatprep.subr.bf16.mxu0 %v227_v0  ;;  %138 = vmatprep.mubr.msk.bf16.mxu0 %vm228_vm0, %v227_v0  ;;  %v42_v3 = vld [vmem:[#allocation2] sm:$0xf]  ;;  %vm66_vm1 = vcmask 261120   ;;  %s229_s1 = smov [#allocation7]  }
  0x28   :  { %135 = vmatpush3.bf16.msra.mxu0 %v149_v1  ;;  %v127_v4 = vld [vmem:[%s298_s2] ss:$0 sm:$0xff]  ;;  %s117_s12 = sshll.u32 %s229_s1, 4  ;;  %s118_s12 = int_to_ptr.vmem [resolvable:$true] %s117_s12 }
  0x29   :  { %136 = vmatprep.subr.bf16.mxu0 %v227_v0  ;;  %s195_s13 = scalar_lea.vmem %s118_s12, 128  ;;  %p200_p3 = scmp.lt.s32.totalorder %s118_s12, %s118_s12 }
  0x2a   :  { %p196_p2 = scmp.ne.s32.totalorder %s118_s12, %s195_s13  ;;  %p201_p4 = scmp.lt.s32.totalorder %s195_s13, %s195_s13 }
  0x2c   :  { %137 = vmatpush3.bf16.msra.mxu0 %v150_v2  ;;  %p202_p5 = por %p201_p4, %p200_p3 }
  0x2e   :  { %p203_p6 = pnand %p202_p5, %p196_p2 }
  0x2f   :  { %139 = vmatmul.mubr.msk.bf16.vlgmr.msra.gmra.mrb[0].mxu0 %vm66_vm1, %v42_v3 }
 0x102   :  { %v104_v5 = vpop.f32.mrb[0].mxu0 }
 0x103   :  { %v105_v6 = vadd.f32 %v127_v4, %v104_v5  ;;  %v140_v7 = vpop.f32.mrb[1].mxu0 }
 0x104   :  { %v107_v8 = vpop.f32.mrb[2].mxu0 }
 0x105   :  { %110 = vst [vmem:[#allocation7] sm:$0xff] %v105_v6  ;;  %v141_v9 = vpop.f32.mrb[3].mxu0 }
 0x106   :  { %206 = shalt.err (!%p203_p6)
}
 0x107   :  { %s207_s2 = scalar_lea.hbm %s299_s3, 128 }
 0x108   :  { %p208_p7 = scmp.ne.s32.totalorder %s299_s3, %s207_s2  ;;  %p211_p8 = scmp.lt.u32.totalorder %s207_s2, %s299_s3 }
 0x10a   :  { %p213_p9 = pnand %p211_p8, %p208_p7 }
 0x10c   :  { %216 = shalt.err (!%p213_p9)
}
 0x10d   :  { %120 = dma.vmem_to_hbm [thread:$0]  %s118_s12, 128, %s299_s3, [#allocation4]  }
 0x10e   :  { %221 = dma.done.wait [#allocation4], 128  }
 0x10f   :  { %222 = vsyncadd [#allocation4], 4294967168 }
 0x110   :  { %124 = vsyncpa [#allocation3], 1 }
 0x111   :  { %125 = vsyncpa [#allocation6], 1 }
 0x112   :  { %126 = vsyncpa [#allocation4], 1 }

</bundles_post_ra>
